<compile_context>
chip_gen: v7x
topology: tpu7x:2x2x1
jax: 0.10.0
libtpu: 0.0.40
codegen_flags: <defaults>
</compile_context>

<pallas_src>
import numpy as np
import jax
import jax.numpy as jnp
from jax.experimental import pallas as pl
from jax.experimental.pallas import tpu as pltpu


def _flatten_dma_kernel(x_hbm, o_hbm, sem):
    # Element order is already correct (row-major flatten), so the entire
    # forward pass is a single contiguous full-bandwidth HBM->HBM DMA.
    cp = pltpu.make_async_copy(x_hbm, o_hbm, sem)
    cp.start()
    cp.wait()


def flatten_encoder(x: jax.Array, start_dim: int) -> jax.Array:
    """Pallas equivalent of FlattenEncoder(start_dim)(x)."""
    # FlattenEncoder has no learnable parameters; `start_dim` is its only
    # (buffer) state and is passed here as a Python int.
    assert 0 <= start_dim < x.ndim, "start_dim must be in [0, ndim)"
    lead = x.shape[:start_dim]                    # dims kept as-is
    tail = x.shape[start_dim:]                    # dims merged by flatten
    flat = int(np.prod(tail)) if tail else 1
    out_shape = lead + (flat,)

    # The flatten itself: metadata-only reshape (no data movement).
    x_flat = jnp.reshape(x, out_shape)

    nbytes = x.size * x.dtype.itemsize

    return pl.pallas_call(
        _flatten_dma_kernel,
        out_shape=jax.ShapeDtypeStruct(out_shape, x.dtype),
        # Raw HBM refs on both sides: no auto-pipelined VMEM staging at all.
        in_specs=[pl.BlockSpec(memory_space=pl.ANY)],
        out_specs=pl.BlockSpec(memory_space=pl.ANY),
        scratch_shapes=[pltpu.SemaphoreType.DMA],
        cost_estimate=pl.CostEstimate(
            flops=0, transcendentals=0, bytes_accessed=2 * nbytes),
    )(x_flat)


if __name__ == "__main__":
    key = jax.random.PRNGKey(0)
    # Small NCHW input consistent with a conv-style feature map.
    x = jax.random.normal(key, (2, 4, 16, 16), dtype=jnp.float32)

    start_dim = 1  # FlattenEncoder(start_dim=1): (N, C, H, W) -> (N, C*H*W)
    y = flatten_encoder(x, start_dim)
    y = jax.block_until_ready(y)

    # Reference: torch.flatten(x, 1) == row-major reshape to (N, C*H*W).
    ref = jnp.reshape(x, (x.shape[0], -1))
    assert y.shape == (2, 4 * 16 * 16)
    assert y.dtype == x.dtype
    np.testing.assert_allclose(np.asarray(y), np.asarray(ref), rtol=0, atol=0)

    print("KERNEL_OK")
</pallas_src>

<mosaic_0001>
module attributes {stable_mosaic.version = 11 : i64} {
  func.func @_flatten_dma_kernel(%arg0: memref<2x1024xf32, #tpu.memory_space<any>>, %arg1: memref<2x1024xf32, #tpu.memory_space<any>>, %arg2: memref<!tpu.dma_semaphore, #tpu.memory_space<semaphore_mem>>) attributes {dimension_semantics = [], scalar_prefetch = 0 : i64, scratch_operands = 1 : i64, tpu.core_type = #tpu.core_type<tc>} {
    tpu.enqueue_dma source(%arg0 : memref<2x1024xf32, #tpu.memory_space<any>>) target(%arg1 : memref<2x1024xf32, #tpu.memory_space<any>>) target_semaphore(%arg2 : memref<!tpu.dma_semaphore, #tpu.memory_space<semaphore_mem>>)
    tpu.wait_dma2 semaphore(%arg2 : memref<!tpu.dma_semaphore, #tpu.memory_space<semaphore_mem>>) src(%arg0 : memref<2x1024xf32, #tpu.memory_space<any>>) dst(%arg1 : memref<2x1024xf32, #tpu.memory_space<any>>)
    return
  }
}

</mosaic_0001>

<bundles_post_ra>
// kernel: tpu_custom_call.1
= control target key start
LH: loop header
LB: loop body
LE: loop exit
PB: predicated region body
PF: predicated region fallthrough
CT: control target
= control target key end

     0   :  { %s35_s6 = smov [#allocation2]   ;;  %s36_s7 = smov [#allocation3]   ;;  %s54_s0 = inlined_call_operand.hbm [shape: f32[2,1024], index: 0, kind: input, shape index: {}]   ;;  %s55_s1 = inlined_call_operand.hbm [shape: f32[2,1024], index: 1, kind: output, shape index: {}]  }
   0x1   :  { %s37_s8 = smov 0  }
   0x2   :  { %18 = dma.general %s54_s0, 256, %s55_s1, %s35_s6, %s36_s7, [#allocation4], %s37_s8, 0  }
   0x3   :  { %33 = dma.done.wait [#allocation2], 256 }
   0x4   :  { %34 = vsyncadd [#allocation2], 4294967040 }
   0x5   :  { %23 = vsyncmov [#allocation2] }
   0x8   :  { %s24_s13 = vpop.sfrf %23 }
   0x9   :  { %p29_p0 = scmp.ne.s32.totalorder %s24_s13, 0 }
   0xb   :  { %28 = shalt.err (%p29_p0)  }

</bundles_post_ra>
